<compile_context>
chip_gen: v7x
topology: tpu7x:2x2x1
jax: 0.10.0
libtpu: 0.0.40
codegen_flags: <defaults>
</compile_context>

<pallas_src>
import functools

import jax
import jax.numpy as jnp
from jax import lax
from jax.experimental import pallas as pl
from jax.experimental.pallas import tpu as pltpu


def _gem_kernel(p_ref, x_ref, o_ref, acc_ref, *, eps, hw_total, t_hw,
                compute_dtype):
    # p_ref  : (C, 1)        per-channel exponent (shared across the grid)
    # x_ref  : (1, C, t_hw)  one spatial tile of one batch element (NCHW layout)
    # o_ref  : (1, C, 1)     pooled result for this batch element
    # acc_ref: (C, 1) f32    running sum of clamp(x, eps)**p over spatial dims
    k = pl.program_id(1)
    n_k = pl.num_programs(1)

    @pl.when(k == 0)
    def _init():
        acc_ref[...] = jnp.zeros_like(acc_ref)

    p_f32 = p_ref[...].astype(jnp.float32)                       # (C, 1)
    x = x_ref[0]                                                  # (C, t_hw)

    # Element-wise clamp + x**p.  exp/log run on the EUP; optionally in bf16
    # (v6e/v7x) -- accumulation stays f32 either way.
    xc = jnp.maximum(x.astype(compute_dtype), jnp.asarray(eps, compute_dtype))
    xp = jnp.exp(p_f32.astype(compute_dtype) * jnp.log(xc))      # (C, t_hw)
    xp = xp.astype(jnp.float32)

    if hw_total % t_hw != 0:
        # Last tile hangs past H*W: zero padded lanes so they do not
        # contribute to the sum (contents there are undefined, possibly NaN).
        col = lax.broadcasted_iota(jnp.int32, xp.shape, dimension=1)
        remaining = hw_total - k * t_hw
        xp = jnp.where(col < remaining, xp, 0.0)

    # Cross-lane reduction (XLU) of the spatial tile, accumulate in f32.
    acc_ref[...] += jnp.sum(xp, axis=-1, keepdims=True)           # (C, 1)

    @pl.when(k == n_k - 1)
    def _finalize():
        mean = acc_ref[...] * (1.0 / hw_total)                    # true HW count
        # Epilogue runs once per batch element over C values only; exact
        # reciprocal keeps us at f32 reference precision (approx=True would
        # also be fine in production -- this is off the critical path).
        inv_p = pl.reciprocal(p_f32, approx=False)
        y = jnp.exp(inv_p * jnp.log(mean))                        # (C, 1)
        o_ref[...] = y[None].astype(o_ref.dtype)                  # (1, C, 1)


def _pick_block_hw(hw, c, elem_bytes, target_bytes=1 << 20):
    """Spatial tile size: ~1 MiB per input block, multiple of 128 (or full HW)."""
    if hw < 128 or c * hw * elem_bytes <= target_bytes:
        return hw
    t = (target_bytes // (c * elem_bytes)) // 128 * 128
    t = max(128, t)
    return min(t, (hw // 128) * 128)


def fast_group_gem(x_nchw, params, eps=1e-6, *, compute_dtype=jnp.float32,
                   block_hw=None):
    """GeM pooling.  x_nchw: (B, C, H, W); params: (C,) -> (B, C, 1, 1)."""
    B, C, H, W = x_nchw.shape
    assert params.shape == (C,)
    HW = H * W

    # Metadata-only reshape -- no HBM transpose pass.
    x = x_nchw.reshape(B, C, HW)
    p2d = params.reshape(C, 1)

    t_hw = _pick_block_hw(HW, C, x.dtype.itemsize) if block_hw is None else block_hw
    n_hw = pl.cdiv(HW, t_hw)

    kernel = functools.partial(_gem_kernel, eps=eps, hw_total=HW, t_hw=t_hw,
                               compute_dtype=compute_dtype)

    out = pl.pallas_call(
        kernel,
        out_shape=jax.ShapeDtypeStruct((B, C, 1), jnp.float32),
        grid_spec=pltpu.PrefetchScalarGridSpec(
            num_scalar_prefetch=0,
            grid=(B, n_hw),                                # reduction axis last
            in_specs=[
                pl.BlockSpec((C, 1), lambda b, k: (0, 0)),          # p (shared)
                pl.BlockSpec((1, C, t_hw), lambda b, k: (b, 0, k)),  # x tile
            ],
            out_specs=pl.BlockSpec((1, C, 1), lambda b, k: (b, 0, 0)),
            scratch_shapes=[pltpu.VMEM((C, 1), jnp.float32)],
        ),
        compiler_params=pltpu.CompilerParams(
            dimension_semantics=("parallel", "arbitrary")),
    )(p2d, x)

    return out.reshape(B, C, 1, 1).astype(x_nchw.dtype)


def _reference(x_nchw, params, eps=1e-6):
    x = jnp.maximum(x_nchw, eps)
    p = params.reshape(1, -1, 1, 1)
    xp = x ** p
    m = jnp.mean(xp, axis=(2, 3), keepdims=True)
    return m ** (1.0 / p)


if __name__ == "__main__":
    key = jax.random.PRNGKey(0)

    # --- Test 1: small shape, single spatial tile, f32 compute -------------
    B, C, H, W = 2, 4, 16, 16
    x = jax.random.uniform(key, (B, C, H, W), dtype=jnp.float32,
                           minval=0.0, maxval=2.0)
    params = jnp.ones((C,), dtype=jnp.float32) * 3.0   # Parameter(ones(C) * p)

    out = jax.block_until_ready(fast_group_gem(x, params))
    ref = _reference(x, params)
    assert out.shape == (B, C, 1, 1)
    assert jnp.allclose(out, ref, atol=1e-4, rtol=1e-4), (out, ref)

    # --- Test 2: forced spatial tiling with ragged last tile ---------------
    # HW = 144, block_hw = 128 -> 2 tiles, last one masked (accumulator path).
    B2, C2, H2, W2 = 2, 8, 12, 12
    k1, _ = jax.random.split(key)
    x2 = jax.random.uniform(k1, (B2, C2, H2, W2), dtype=jnp.float32,
                            minval=0.0, maxval=2.0)
    p2 = jnp.ones((C2,), dtype=jnp.float32) * 3.0
    out2 = jax.block_until_ready(fast_group_gem(x2, p2, block_hw=128))
    ref2 = _reference(x2, p2)
    assert jnp.allclose(out2, ref2, atol=1e-4, rtol=1e-4), (out2, ref2)

    # --- Test 3: bf16 element-wise path (v6e/v7x EUP optimisation) ---------
    out3 = jax.block_until_ready(
        fast_group_gem(x, params, compute_dtype=jnp.bfloat16))
    assert jnp.allclose(out3, ref, atol=3e-2, rtol=3e-2), (out3, ref)

    print("KERNEL_OK")
</pallas_src>

<mosaic_0001>
module attributes {stable_mosaic.version = 11 : i64} {
  func.func @_gem_kernel(%arg0: i32, %arg1: i32, %arg2: memref<4x1xf32, #tpu.memory_space<vmem>>, %arg3: memref<1x4x256xf32, #tpu.memory_space<vmem>>, %arg4: memref<1x4x1xf32, #tpu.memory_space<vmem>>, %arg5: memref<4x1xf32, #tpu.memory_space<vmem>>) attributes {dimension_semantics = [#tpu.dimension_semantics<parallel>, #tpu.dimension_semantics<arbitrary>], iteration_bounds = array<i64: 2, 1>, scalar_prefetch = 0 : i64, scratch_operands = 1 : i64, tpu.core_type = #tpu.core_type<tc>, window_params = [{pipeline_mode = #tpu.pipeline_mode<synchronous>, transform_indices = @transform_0, window_bounds = array<i64: 4, 1>}, {transform_indices = @transform_1, window_bounds = array<i64: 1, 4, 256>}, {transform_indices = @transform_2, window_bounds = array<i64: 1, 4, 1>}]} {
    %c0_i32 = arith.constant 0 : i32
    %0 = arith.cmpi eq, %arg1, %c0_i32 : i32
    %1 = arith.extui %0 : i1 to i32
    %c0_i32_0 = arith.constant 0 : i32
    %2 = arith.cmpi ne, %1, %c0_i32_0 : i32
    scf.if %2 {
      %cst_12 = arith.constant 0.000000e+00 : f32
      %20 = vector.broadcast %cst_12 : f32 to vector<4x1xf32>
      %c0_13 = arith.constant 0 : index
      %c0_14 = arith.constant 0 : index
      %21 = vector.load %arg5[%c0_13, %c0_14] : memref<4x1xf32, #tpu.memory_space<vmem>>, vector<4x1xf32>
      tpu.vector_store %arg5[%c0_13, %c0_14], %20 {strides = array<i32>} : memref<4x1xf32, #tpu.memory_space<vmem>>, vector<4x1xf32>,
    } else {
    }
    %c0 = arith.constant 0 : index
    %c0_1 = arith.constant 0 : index
    %3 = vector.load %arg2[%c0, %c0_1] : memref<4x1xf32, #tpu.memory_space<vmem>>, vector<4x1xf32>
    %c0_2 = arith.constant 0 : index
    %c0_3 = arith.constant 0 : index
    %c0_4 = arith.constant 0 : index
    %4 = vector.load %arg3[%c0_2, %c0_3, %c0_4] : memref<1x4x256xf32, #tpu.memory_space<vmem>>, vector<1x4x256xf32>
    %5 = vector.shape_cast %4 : vector<1x4x256xf32> to vector<4x256xf32>
    %cst = arith.constant 9.99999997E-7 : f32
    %6 = vector.broadcast %cst : f32 to vector<4x256xf32>
    %7 = arith.maximumf %5, %6 : vector<4x256xf32>
    %8 = math.log %7 : vector<4x256xf32>
    %9 = vector.broadcast %3 : vector<4x1xf32> to vector<4x256xf32>
    %10 = arith.mulf %9, %8 : vector<4x256xf32>
    %11 = math.exp %10 : vector<4x256xf32>
    %c0_5 = arith.constant 0 : index
    %c0_6 = arith.constant 0 : index
    %12 = vector.load %arg5[%c0_5, %c0_6] : memref<4x1xf32, #tpu.memory_space<vmem>>, vector<4x1xf32>
    %cst_7 = arith.constant dense<0.000000e+00> : vector<4xf32>
    %13 = vector.multi_reduction <add>, %11, %cst_7 [1] : vector<4x256xf32> to vector<4xf32>
    %14 = vector.shape_cast %13 : vector<4xf32> to vector<4x1xf32>
    %15 = arith.addf %12, %14 : vector<4x1xf32>
    %c0_8 = arith.constant 0 : index
    %c0_9 = arith.constant 0 : index
    %16 = vector.load %arg5[%c0_8, %c0_9] : memref<4x1xf32, #tpu.memory_space<vmem>>, vector<4x1xf32>
    tpu.vector_store %arg5[%c0_8, %c0_9], %15 {strides = array<i32>} : memref<4x1xf32, #tpu.memory_space<vmem>>, vector<4x1xf32>,
    %c0_i32_10 = arith.constant 0 : i32
    %17 = arith.cmpi eq, %arg1, %c0_i32_10 : i32
    %18 = arith.extui %17 : i1 to i32
    %c0_i32_11 = arith.constant 0 : i32
    %19 = arith.cmpi ne, %18, %c0_i32_11 : i32
    scf.if %19 {
      %c0_12 = arith.constant 0 : index
      %c0_13 = arith.constant 0 : index
      %20 = vector.load %arg5[%c0_12, %c0_13] : memref<4x1xf32, #tpu.memory_space<vmem>>, vector<4x1xf32>
      %cst_14 = arith.constant 3.906250e-03 : f32
      %21 = vector.broadcast %cst_14 : f32 to vector<4x1xf32>
      %22 = arith.mulf %20, %21 : vector<4x1xf32>
      %23 = tpu.reciprocal %3 : vector<4x1xf32> -> vector<4x1xf32>
      %24 = math.log %22 : vector<4x1xf32>
      %25 = arith.mulf %23, %24 : vector<4x1xf32>
      %26 = math.exp %25 : vector<4x1xf32>
      %27 = vector.shape_cast %26 : vector<4x1xf32> to vector<1x4x1xf32>
      %c0_15 = arith.constant 0 : index
      %c0_16 = arith.constant 0 : index
      %c0_17 = arith.constant 0 : index
      %28 = vector.load %arg4[%c0_15, %c0_16, %c0_17] : memref<1x4x1xf32, #tpu.memory_space<vmem>>, vector<1x4x1xf32>
      tpu.vector_store %arg4[%c0_15, %c0_16, %c0_17], %27 {strides = array<i32>} : memref<1x4x1xf32, #tpu.memory_space<vmem>>, vector<1x4x1xf32>,
    } else {
    }
    return
  }
  func.func @transform_0(%arg0: i32, %arg1: i32) -> (i32, i32) {
    %c0_i32 = arith.constant 0 : i32
    %c0_i32_0 = arith.constant 0 : i32
    %c0_i32_1 = arith.constant 0 : i32
    return %c0_i32, %c0_i32_0 : i32, i32
  }
  func.func @transform_1(%arg0: i32, %arg1: i32) -> (i32, i32, i32) {
    %c0_i32 = arith.constant 0 : i32
    %c0_i32_0 = arith.constant 0 : i32
    return %arg0, %c0_i32, %arg1 : i32, i32, i32
  }
  func.func @transform_2(%arg0: i32, %arg1: i32) -> (i32, i32, i32) {
    %c0_i32 = arith.constant 0 : i32
    %c0_i32_0 = arith.constant 0 : i32
    %c0_i32_1 = arith.constant 0 : i32
    return %arg0, %c0_i32, %c0_i32_0 : i32, i32, i32
  }
}

</mosaic_0001>

<bundles_post_ra>
// kernel: tpu_custom_call.1
= control target key start
LH: loop header
LB: loop body
LE: loop exit
PB: predicated region body
PF: predicated region fallthrough
CT: control target
= control target key end

     0   :  { %7 = vsyncpa [#allocation4], 0  ;;  %s614_s0 = inlined_call_operand.vmem [shape: f32[4,1], index: 0, kind: input, shape index: {}]   ;;  %s615_s1 = inlined_call_operand.hbm [shape: f32[2,4,256], index: 1, kind: input, shape index: {}]   ;;  %s616_s2 = inlined_call_operand.vmem [shape: f32[2,4,1], index: 2, kind: output, shape index: {}]  }
   0x1   :  { %9 = vsyncpa [#allocation4 + $0x1], 0  ;;  %s483_s9 = smov 0   ;;  %s485_s10 = smov 0  }
   0x2   :  { %s487_s11 = smov 0   ;;  %s489_s12 = smov 0  }
   0x3   :  { %s491_s13 = smov 0   ;;  %s493_s14 = smov 0  }
   0x4 LB: > { %s300_s15 = sadd.s32 4294967295, %s463_s14   ;;  %s27_s16 = sadd.s32 1, %s459_s13  ;;  %s463_s14 = sphi %s493_s14, %s15_s14   ;;  %s459_s13 = sphi %s491_s13, %s626_s13   ;;  %s455_s12 = sphi %s489_s12, %s625_s12   ;;  %s451_s11 = sphi %s487_s11, %s624_s11   ;;  %s447_s10 = sphi %s485_s10, %s623_s10   ;;  %s443_s9 = sphi %s483_s9, %s622_s9  }
   0x5   : > { %p29_p0 = scmp.ge.s32.totalorder %s27_s16, 2  ;;  %s57_s17 = sadd.s32 1, %s451_s11 }
   0x6   : > { %p64_p1 = scmp.ne.s32.totalorder %s451_s11, %s447_s10  ;;  %p65_p2 = scmp.eq.s32.totalorder %s463_s14, 0 }
   0x7   : > { %s628_s16 = smov (%p29_p0, %s27_s16), 0  ;;  %p70_p4 = scmp.ne.s32.totalorder %s447_s10, %s443_s9 }
   0x8   : > { %p519_p3 = por %p65_p2, %p64_p1  ;;  %s52_s19 = ssub.s32 %s459_s13, %s628_s16 }
   0x9   : > { %p71_p5 = scmp.eq.s32.totalorder %s300_s15, 0  ;;  %p55_p6 = scmp.eq.s32.totalorder %s52_s19, 0 }
   0xa   : > { %p319_p8 = scmp.lt.s32.totalorder %s463_s14, 2  ;;  %s123_s22 = sand.u32 1, %s451_s11  }
   0xb   : > { %p526_p7 = por %p71_p5, %p70_p4  ;;  %s312_s23 = sshll.u32 %s459_s13, 7 }
   0xc   : > { %s532_s21 = scalar_select %p55_p6, %s451_s11, %s57_s17  }
   0xd   : > { %s304_s24 = sshll.u32 %s123_s22, 3  ;;  %s539_s27 = scalar_lea.hbm %s615_s1, %s312_s23 }
   0xe   : > { %s127_s28 = scalar_lea.vmem [#allocation3], %s304_s24  ;;  %p543_p9 = pnand %p319_p8, %p519_p3 }
   0xf   : > { %s137_s29 = sshll.u32 %s127_s28, 4  ;;  %s124_s3 = scalar_lea.sflag [#allocation4], %s123_s22  ;;  %s547_s29 = int_to_ptr.vmem [resolvable:$true] %s137_s29 }
  0x10   : > { %s383_s4 = scalar_lea.hbm %s539_s27, 128  ;;  %p385_p13 = pneg %p543_p9 }
  0x11   : > { %p384_p12 = scmp.ne.s32.totalorder %s539_s27, %s383_s4  ;;  %s388_s7 = scalar_lea.hbm %s615_s1, 256 }
  0x12   : > { %p389_p2 = scmp.lt.u32.totalorder %s539_s27, %s615_s1  ;;  %p390_p3 = scmp.lt.u32.totalorder %s388_s7, %s383_s4 }
  0x13   : > { %p386_p0 = pnand %p385_p13, %p384_p12  ;;  %p392_p5 = scmp.lt.u32.totalorder %s383_s4, %s539_s27 }
  0x14   : > { %p391_p4 = por %p390_p3, %p389_p2 }
  0x15   : > { %p387_p1 = pneg %p386_p0 }
  0x16   : > { %p393_p6 = por %p392_p5, %p391_p4 }
  0x18   : > { %p394_p8 = pnand %p393_p6, %p387_p1 }
  0x1a   : > { %397 = shalt.err (!%p394_p8)
}
  0x1b   : > { %s398_s15 = scalar_lea.vmem %s547_s29, 128  ;;  %s465_s17 = smov [#allocation3]  }
  0x1c   : > { %p399_p12 = scmp.ne.s32.totalorder %s547_s29, %s398_s15  ;;  %s403_s18 = sshll.u32 %s465_s17, 4  ;;  %s404_s18 = int_to_ptr.vmem [resolvable:$false] %s403_s18 }
  0x1d   : > { %s405_s19 = scalar_lea.vmem %s404_s18, 256  ;;  %p406_p11 = scmp.lt.s32.totalorder %s547_s29, %s404_s18 }
  0x1e   : > { %p401_p0 = pnand %p399_p12, %p385_p13  ;;  %p407_p2 = scmp.lt.s32.totalorder %s405_s19, %s398_s15 }
  0x20   : > { %p402_p10 = pneg %p401_p0  ;;  %p408_p3 = por %p407_p2, %p406_p11 }
  0x22   : > { %p409_p4 = pnand %p408_p3, %p402_p10 }
  0x24   : > { %412 = shalt.err (!%p409_p4)
}
  0x25   : > { %318 = dma.hbm_to_vmem [thread:$0]  (!%p543_p9), %s539_s27, 128, %s547_s29, %s124_s3  }
  0x26   : > { %p620_p1 = scmp.lt.s32.totalorder %s463_s14, 3  ;;  %p621_p5 = scmp.ge.s32.totalorder %s463_s14, 1 }
  0x28   : > { %p143_p13 = pnand %p621_p5, %p620_p1 }
  0x29   : > { %s148_s22 = sand.u32 (!%p143_p13), 1, %s447_s10  }
  0x2a   : > { %146 = sbr.rel (%p143_p13) target bundleno = 382 (0x17e), region = 28  ;;  %s308_s23 = sshll.u32 (!%p143_p13), %s148_s22, 3 }
  0x2b   : > { %s149_s24 = scalar_lea.sflag (!%p143_p13), [#allocation4], %s148_s22  ;;  %s152_s25 = scalar_lea.vmem (!%p143_p13), [#allocation3], %s308_s23 }
  0x31   : > { %438 = dma.done.wait (%p526_p7), %s149_s24, 128  }
  0x32   : > { %440 = vsyncadd (%p526_p7), %s149_s24, 4294967168  ;;  %vm181_vm0 = vcmask 3072   ;;  %v466_v0 = vmov 0.0   ;;  %v467_v1 = vmov 0   ;;  %v183_v2 = vld [vmem:[%s614_s0] sm:$0xf] }
  0x33   : > { %182 = vst.msk [vmem:[#allocation2] sm:$0xf] %vm181_vm0, %v466_v0  ;;  %370 = vset.pattern.permute.xlu0 %v467_v1  ;;  %v184_v3 = vld [vmem:[%s152_s25] sm:$0xff]  ;;  %vm203_vm1 = vcmask 1043456   ;;  %p173_p7 = scmp.lt.s32.totalorder %s455_s12, 1 }
  0x34   : > { %190 = vperm.xlu0 %370, %v183_v2   ;;  %v185_v4 = vmax.f32 %v184_v3, 1e-06 }
  0x35   : > { %s630_s12 = smov (!%p173_p7, %s455_s12), 1 }
  0x36   : > { %371 = vlog2.f32 %v185_v4  ;;  %s309_s20 = sshll.u32 %s630_s12, 2 }
  0x37   : > { %s176_s30 = scalar_lea.vmem %s616_s2, %s309_s20 }
  0x3a   : > { %v202_v18 = vld [vmem:[#allocation2] sm:$0xf] }
  0x40   : > { %v372_v5 = vpop.eup %371 }
  0x41   : > { %v187_v6 = vmul.f32 0.6931472, %v372_v5 }
  0x43   : > { %v194_v7 = vcombine.high %v187_v6, %v187_v6 }
  0xb3   : > { %v191_v8 = vpop.permute.xlu0 %190 }
  0xb4   : > { %v196_v9 = vmul.f32 %v191_v8, %v187_v6  ;;  %v197_v10 = vmul.f32 %v194_v7, %v191_v8 }
  0xb6   : > { %v198_v11 = vmul.f32 1.442695, %v196_v9  ;;  %v200_v12 = vmul.f32 1.442695, %v197_v10 }
  0xb8   : > { %373 = vpow2.f32 %v198_v11 }
  0xb9   : > { %375 = vpow2.f32 %v200_v12 }
  0xba   : > { %377 = vrcp.f32 %v183_v2 }
  0xc2   : > { %v374_v13 = vpop.eup %373 }
  0xc3   : > { %v376_v14 = vpop.eup %375  ;;  %v204_v15 = vsel %vm203_vm1, %v374_v13, 0.0 }
  0xc4   : > { %v205_v16 = vsel %vm203_vm1, %v376_v14, 0.0  ;;  %v378_v23 = vpop.eup %377 }
  0xc5   : > { %v206_v17 = vadd.f32 %v205_v16, %v204_v15 }
  0xc7   : > { %207 = vadd.xlane.f32.xlu0 %v206_v17 }
 0x154   : > { %v208_v19 = vpop.xlane.xlu0 %207 }
 0x155   : > { %v209_v20 = vadd.f32 %v208_v19, %v202_v18 }
 0x157   : > { %211 = vst.msk [vmem:[#allocation2] sm:$0xf] %vm181_vm0, %v209_v20 }
 0x15e   : > { %v215_v21 = vld [vmem:[#allocation2] sm:$0xf] }
 0x15f   : > { %v216_v22 = vmul.f32 0.00390625, %v215_v21 }
 0x161   : > { %379 = vlog2.f32 %v216_v22 }
 0x16b   : > { %v380_v24 = vpop.eup %379 }
 0x16c   : > { %v219_v25 = vmul.f32 0.6931472, %v380_v24 }
 0x16e   : > { %v220_v26 = vmul.f32 %v378_v23, %v219_v25 }
 0x170   : > { %v221_v27 = vmul.f32 1.442695, %v220_v26 }
 0x172   : > { %381 = vpow2.f32 %v221_v27 }
 0x17c   : > { %v382_v28 = vpop.eup %381 }
 0x17d   : > { %223 = vst.msk [vmem:[%s176_s30] sm:$0xf] %vm181_vm0, %v382_v28 }
 0x17e PF: > { %s15_s14 = sadd.s32 1, %s463_s14   ;;  %s622_s9 = smov %s447_s10 }
 0x17f   : > { %p12_p9 = scmp.ge.s32.totalorder %s15_s14, 4   ;;  %s623_s10 = smov %s451_s11 }
 0x180   : > { %s624_s11 = smov %s532_s21  ;;  %s625_s12 = smov %s459_s13 }
 0x181   : > { %s626_s13 = smov %s628_s16  ;;  %14 = sbr.rel (!%p12_p9) target bundleno = 4 (0x4), region = 76 }
 0x188   :  { %243 = vsyncpa [#allocation4], 1 }
 0x189   :  { %245 = vsyncpa [#allocation4 + $0x1], 1 }

</bundles_post_ra>
